<compile_context>
chip_gen: v7x
topology: tpu7x:2x2x1
jax: 0.10.0
libtpu: 0.0.40
codegen_flags: <defaults>
</compile_context>

<pallas_src>
import functools

import jax
import jax.numpy as jnp
from jax.experimental import pallas as pl
from jax.experimental.pallas import tpu as pltpu


def _round_up(x, m):
    return ((x + m - 1) // m) * m


def masked_linear_kernel(x_ref, wt_ref, b_ref, o_ref, acc_ref):
    # x_ref:  (tm, tk)   input tile
    # wt_ref: (tk, tn)   pre-transposed weight tile (W.T)
    # b_ref:  (1,  tn)   bias row tile
    # o_ref:  (tm, tn)   output tile
    # acc_ref:(tm, tn)   f32 accumulator (persists across the K axis)
    k = pl.program_id(2)

    @pl.when(k == 0)
    def _():
        acc_ref[...] = jnp.zeros_like(acc_ref)

    acc_ref[...] += jnp.dot(
        x_ref[...], wt_ref[...], preferred_element_type=jnp.float32
    )

    @pl.when(k == pl.num_programs(2) - 1)
    def _():
        o_ref[...] = (
            acc_ref[...] + b_ref[...].astype(jnp.float32)
        ).astype(o_ref.dtype)


@functools.partial(jax.jit, static_argnames=("tm", "tn", "tk", "compute_dtype"))
def masked_linear(x, W, b, *, tm=128, tn=128, tk=128, compute_dtype=None):
    """out = x @ W.T + b  (F.linear semantics).

    x: (B, Fin), W: (Fout, Fin), b: (Fout,)  ->  (B, Fout)
    compute_dtype: optionally cast operands (e.g. jnp.bfloat16 on v6e/v7x)
                   while accumulating in f32.
    """
    B, Fin = x.shape
    Fout, Fin_w = W.shape
    assert Fin == Fin_w
    assert b.shape == (Fout,)
    out_dtype = x.dtype

    if compute_dtype is not None:
        x = x.astype(compute_dtype)
        W = W.astype(compute_dtype)

    # Pad every dim up to a tile multiple (zero padding is exact for matmul;
    # padded rows/cols are sliced off below).
    Bp = _round_up(B, tm)
    Kp = _round_up(Fin, tk)
    Np = _round_up(Fout, tn)

    Wt = W.T  # (Fin, Fout) -- single transpose in the wrapper, not per-step.
    x_p = jnp.pad(x, ((0, Bp - B), (0, Kp - Fin)))
    wt_p = jnp.pad(Wt, ((0, Kp - Fin), (0, Np - Fout)))
    b_p = jnp.pad(b.astype(jnp.float32), (0, Np - Fout)).reshape(1, Np)

    grid = (Bp // tm, Np // tn, Kp // tk)

    out_p = pl.pallas_call(
        masked_linear_kernel,
        out_shape=jax.ShapeDtypeStruct((Bp, Np), out_dtype),
        grid_spec=pltpu.PrefetchScalarGridSpec(
            num_scalar_prefetch=0,
            grid=grid,
            in_specs=[
                pl.BlockSpec((tm, tk), lambda i, j, k: (i, k)),  # x tile
                pl.BlockSpec((tk, tn), lambda i, j, k: (k, j)),  # W.T tile
                pl.BlockSpec((1, tn), lambda i, j, k: (0, j)),   # bias row
            ],
            out_specs=pl.BlockSpec((tm, tn), lambda i, j, k: (i, j)),
            scratch_shapes=[pltpu.VMEM((tm, tn), jnp.float32)],
        ),
        compiler_params=pltpu.CompilerParams(
            dimension_semantics=("parallel", "parallel", "arbitrary"),
        ),
    )(x_p, wt_p, b_p)

    return out_p[:B, :Fout]


def build_masked_linear_params(key, n_in, n_out, m_in, m_out):
    """Deterministically reproduce MaskedLinear.__init__ parameter construction."""
    k_base_w, k_base_b, k_w, k_b = jax.random.split(key, 4)
    # base_layer weights/bias (stand-in for the pretrained nn.Linear)
    W_base = jax.random.normal(k_base_w, (n_out, n_in), dtype=jnp.float32)
    b_base = jax.random.normal(k_base_b, (n_out,), dtype=jnp.float32)
    # W = randn(n_out+m_out, n_in+m_in); W[:n_out,:n_in]=W_base; W[:n_out,n_in:]=0
    W = jax.random.normal(k_w, (n_out + m_out, n_in + m_in), dtype=jnp.float32)
    W = W.at[:n_out, :n_in].set(W_base)
    W = W.at[:n_out, n_in:].set(0.0)
    # b = randn(n_out+m_out); b[:n_out] = b_base
    b = jax.random.normal(k_b, (n_out + m_out,), dtype=jnp.float32)
    b = b.at[:n_out].set(b_base)
    return W, b


if __name__ == "__main__":
    key = jax.random.PRNGKey(0)
    k_param, k_x = jax.random.split(key)

    # Small shapes consistent with the module: base layer 24 -> 20,
    # augmented by m_in=8 extra inputs and m_out=12 extra outputs.
    n_in, n_out = 24, 20
    m_in, m_out = 8, 12
    batch = 8  # not a multiple of the 128 tile -> exercises the padding path

    W, b = build_masked_linear_params(k_param, n_in, n_out, m_in, m_out)
    x = jax.random.normal(k_x, (batch, n_in + m_in), dtype=jnp.float32)

    out = masked_linear(x, W, b)
    out = jax.block_until_ready(out)

    # Pure-JAX reference (F.linear semantics)
    ref = x @ W.T + b
    assert out.shape == (batch, n_out + m_out)
    assert jnp.allclose(out, ref, atol=1e-4, rtol=1e-4), "mismatch vs reference"

    print("KERNEL_OK")
</pallas_src>

<mosaic_0001>
module attributes {stable_mosaic.version = 11 : i64} {
  func.func @masked_linear_kernel(%arg0: i32, %arg1: i32, %arg2: i32, %arg3: memref<128x128xf32, #tpu.memory_space<vmem>>, %arg4: memref<128x128xf32, #tpu.memory_space<vmem>>, %arg5: memref<1x128xf32, #tpu.memory_space<vmem>>, %arg6: memref<128x128xf32, #tpu.memory_space<vmem>>, %arg7: memref<128x128xf32, #tpu.memory_space<vmem>>) attributes {dimension_semantics = [#tpu.dimension_semantics<parallel>, #tpu.dimension_semantics<parallel>, #tpu.dimension_semantics<arbitrary>], iteration_bounds = array<i64: 1, 1, 1>, scalar_prefetch = 0 : i64, scratch_operands = 1 : i64, tpu.core_type = #tpu.core_type<tc>, window_params = [{transform_indices = @transform_0, window_bounds = array<i64: 128, 128>}, {transform_indices = @transform_1, window_bounds = array<i64: 128, 128>}, {transform_indices = @transform_2, window_bounds = array<i64: 1, 128>}, {transform_indices = @transform_3, window_bounds = array<i64: 128, 128>}]} {
    %c0_i32 = arith.constant 0 : i32
    %0 = arith.cmpi eq, %arg2, %c0_i32 : i32
    %1 = arith.extui %0 : i1 to i32
    %c0_i32_0 = arith.constant 0 : i32
    %2 = arith.cmpi ne, %1, %c0_i32_0 : i32
    scf.if %2 {
      %cst_10 = arith.constant 0.000000e+00 : f32
      %12 = vector.broadcast %cst_10 : f32 to vector<128x128xf32>
      %c0_11 = arith.constant 0 : index
      %c0_12 = arith.constant 0 : index
      %13 = vector.load %arg7[%c0_11, %c0_12] : memref<128x128xf32, #tpu.memory_space<vmem>>, vector<128x128xf32>
      tpu.vector_store %arg7[%c0_11, %c0_12], %12 {strides = array<i32>} : memref<128x128xf32, #tpu.memory_space<vmem>>, vector<128x128xf32>,
    } else {
    }
    %c0 = arith.constant 0 : index
    %c0_1 = arith.constant 0 : index
    %3 = vector.load %arg7[%c0, %c0_1] : memref<128x128xf32, #tpu.memory_space<vmem>>, vector<128x128xf32>
    %c0_2 = arith.constant 0 : index
    %c0_3 = arith.constant 0 : index
    %4 = vector.load %arg3[%c0_2, %c0_3] : memref<128x128xf32, #tpu.memory_space<vmem>>, vector<128x128xf32>
    %c0_4 = arith.constant 0 : index
    %c0_5 = arith.constant 0 : index
    %5 = vector.load %arg4[%c0_4, %c0_5] : memref<128x128xf32, #tpu.memory_space<vmem>>, vector<128x128xf32>
    %cst = arith.constant dense<0.000000e+00> : vector<128x128xf32>
    %6 = tpu.matmul %4, %5, %cst {dimension_numbers = #tpu.dot_dimension_numbers<[1], [0], [0], [1], [0, 0, 1, 1], [], []>} : vector<128x128xf32>, vector<128x128xf32>, vector<128x128xf32> -> vector<128x128xf32>
    %7 = arith.addf %3, %6 : vector<128x128xf32>
    %c0_6 = arith.constant 0 : index
    %c0_7 = arith.constant 0 : index
    %8 = vector.load %arg7[%c0_6, %c0_7] : memref<128x128xf32, #tpu.memory_space<vmem>>, vector<128x128xf32>
    tpu.vector_store %arg7[%c0_6, %c0_7], %7 {strides = array<i32>} : memref<128x128xf32, #tpu.memory_space<vmem>>, vector<128x128xf32>,
    %c0_i32_8 = arith.constant 0 : i32
    %9 = arith.cmpi eq, %arg2, %c0_i32_8 : i32
    %10 = arith.extui %9 : i1 to i32
    %c0_i32_9 = arith.constant 0 : i32
    %11 = arith.cmpi ne, %10, %c0_i32_9 : i32
    scf.if %11 {
      %c0_10 = arith.constant 0 : index
      %c0_11 = arith.constant 0 : index
      %12 = vector.load %arg7[%c0_10, %c0_11] : memref<128x128xf32, #tpu.memory_space<vmem>>, vector<128x128xf32>
      %c0_12 = arith.constant 0 : index
      %c0_13 = arith.constant 0 : index
      %13 = vector.load %arg5[%c0_12, %c0_13] : memref<1x128xf32, #tpu.memory_space<vmem>>, vector<1x128xf32>
      %14 = vector.broadcast %13 : vector<1x128xf32> to vector<128x128xf32>
      %15 = arith.addf %12, %14 : vector<128x128xf32>
      %c0_14 = arith.constant 0 : index
      %c0_15 = arith.constant 0 : index
      %16 = vector.load %arg6[%c0_14, %c0_15] : memref<128x128xf32, #tpu.memory_space<vmem>>, vector<128x128xf32>
      tpu.vector_store %arg6[%c0_14, %c0_15], %15 {strides = array<i32>} : memref<128x128xf32, #tpu.memory_space<vmem>>, vector<128x128xf32>,
    } else {
    }
    return
  }
  func.func @transform_0(%arg0: i32, %arg1: i32, %arg2: i32) -> (i32, i32) {
    %c0_i32 = arith.constant 0 : i32
    return %arg0, %arg2 : i32, i32
  }
  func.func @transform_1(%arg0: i32, %arg1: i32, %arg2: i32) -> (i32, i32) {
    %c0_i32 = arith.constant 0 : i32
    return %arg2, %arg1 : i32, i32
  }
  func.func @transform_2(%arg0: i32, %arg1: i32, %arg2: i32) -> (i32, i32) {
    %c0_i32 = arith.constant 0 : i32
    %c0_i32_0 = arith.constant 0 : i32
    return %c0_i32, %arg1 : i32, i32
  }
  func.func @transform_3(%arg0: i32, %arg1: i32, %arg2: i32) -> (i32, i32) {
    %c0_i32 = arith.constant 0 : i32
    return %arg0, %arg1 : i32, i32
  }
}

</mosaic_0001>

<bundles_post_ra>
// kernel: masked_linear.1
= control target key start
LH: loop header
LB: loop body
LE: loop exit
PB: predicated region body
PF: predicated region fallthrough
CT: control target
= control target key end

     0   :  { %s625_s1 = inlined_call_operand.vmem [shape: f32[128,128], index: 1, kind: input, shape index: {}]   ;;  %s626_s0 = inlined_call_operand.vmem [shape: f32[128,128], index: 0, kind: input, shape index: {}]   ;;  %s627_s2 = inlined_call_operand.vmem [shape: f32[1,128], index: 2, kind: input, shape index: {}]   ;;  %s628_s3 = inlined_call_operand.vmem [shape: f32[128,128], index: 3, kind: output, shape index: {}]  }
   0x1   :  { %v66_v0 = vld [vmem:[%s625_s1] sm:$0xff]  ;;  %v67_v1 = vld [vmem:[%s625_s1 + $0x8] sm:$0xff]  ;;  %v68_v2 = vld [vmem:[%s625_s1 + $0x10] sm:$0xff] }
   0x2   :  { %v410_v3 = vpack.c.bf16 %v67_v1, %v66_v0  ;;  %v69_v4 = vld [vmem:[%s625_s1 + $0x18] sm:$0xff]  ;;  %v70_v6 = vld [vmem:[%s625_s1 + $0x20] sm:$0xff]  ;;  %v71_v7 = vld [vmem:[%s625_s1 + $0x28] sm:$0xff] }
   0x3   :  { %v414_v5 = vpack.c.bf16 %v69_v4, %v68_v2  ;;  %v418_v8 = vpack.c.bf16 %v71_v7, %v70_v6  ;;  %v50_v9 = vld [vmem:[%s626_s0] sm:$0xff]  ;;  %v72_v11 = vld [vmem:[%s625_s1 + $0x30] sm:$0xff]  ;;  %v73_v12 = vld [vmem:[%s625_s1 + $0x38] sm:$0xff] }
   0x4   :  { %411 = vmatprep.subr.bf16.mxu0 %v410_v3  ;;  %442 = vmatprep.subr.bf16.mxu1 %v410_v3  ;;  %v58_v10 = vld [vmem:[%s626_s0 + $0x40] sm:$0xff]  ;;  %v422_v13 = vpack.c.bf16 %v73_v12, %v72_v11  ;;  %v75_v15 = vld [vmem:[%s625_s1 + $0x48] sm:$0xff]  ;;  %v76_v17 = vld [vmem:[%s625_s1 + $0x50] sm:$0xff] }
   0x5   :  { %413 = vmatpush3.bf16.msra.mxu0 %v410_v3  ;;  %450 = vmatpush3.bf16.msra.mxu1 %v410_v3  ;;  %v74_v14 = vld [vmem:[%s625_s1 + $0x40] sm:$0xff]  ;;  %v77_v18 = vld [vmem:[%s625_s1 + $0x58] sm:$0xff]  ;;  %v79_v21 = vld [vmem:[%s625_s1 + $0x68] sm:$0xff] }
   0x6   :  { %415 = vmatprep.subr.bf16.mxu0 %v414_v5  ;;  %443 = vmatprep.subr.bf16.mxu1 %v414_v5  ;;  %v426_v16 = vpack.c.bf16 %v75_v15, %v74_v14  ;;  %v430_v19 = vpack.c.bf16 %v77_v18, %v76_v17  ;;  %v78_v20 = vld [vmem:[%s625_s1 + $0x60] sm:$0xff]  ;;  %v80_v23 = vld [vmem:[%s625_s1 + $0x70] sm:$0xff]  ;;  %v81_v24 = vld [vmem:[%s625_s1 + $0x78] sm:$0xff] }
   0x7   :  { %386 = vmatprep.mubr.f32.mxu0 %v50_v9  ;;  %398 = vmatprep.mubr.f32.mxu1 %v58_v10  ;;  %v434_v22 = vpack.c.bf16 %v79_v21, %v78_v20  ;;  %v438_v25 = vpack.c.bf16 %v81_v24, %v80_v23  ;;  %v51_v26 = vld [vmem:[%s626_s0 + $0x8] sm:$0xff]  ;;  %v52_v28 = vld [vmem:[%s626_s0 + $0x10] sm:$0xff]  ;;  %v53_v30 = vld [vmem:[%s626_s0 + $0x18] sm:$0xff] }
   0x8   :  { %v59_v27 = vld [vmem:[%s626_s0 + $0x48] sm:$0xff]  ;;  %v60_v29 = vld [vmem:[%s626_s0 + $0x50] sm:$0xff]  ;;  %v61_v31 = vld [vmem:[%s626_s0 + $0x58] sm:$0xff] }
   0x9   :  { %417 = vmatpush3.bf16.msra.mxu0 %v414_v5  ;;  %451 = vmatpush3.bf16.msra.mxu1 %v414_v5  ;;  %v54_v32 = vld [vmem:[%s626_s0 + $0x20] sm:$0xff]  ;;  %v55_v34 = vld [vmem:[%s626_s0 + $0x28] sm:$0xff]  ;;  %v56_v36 = vld [vmem:[%s626_s0 + $0x30] sm:$0xff] }
   0xa   :  { %419 = vmatprep.subr.bf16.mxu0 %v418_v8  ;;  %444 = vmatprep.subr.bf16.mxu1 %v418_v8  ;;  %v62_v33 = vld [vmem:[%s626_s0 + $0x60] sm:$0xff]  ;;  %v63_v35 = vld [vmem:[%s626_s0 + $0x68] sm:$0xff]  ;;  %v64_v37 = vld [vmem:[%s626_s0 + $0x70] sm:$0xff] }
   0xb   :  { %v57_v38 = vld [vmem:[%s626_s0 + $0x38] sm:$0xff]  ;;  %v321_v40 = vld [vmem:[%s627_s2] ss:$0 sm:$0xff] }
   0xc   :  { %v65_v39 = vld [vmem:[%s626_s0 + $0x78] sm:$0xff] }
   0xd   :  { %421 = vmatpush3.bf16.msra.mxu0 %v418_v8  ;;  %452 = vmatpush3.bf16.msra.mxu1 %v418_v8 }
   0xe   :  { %423 = vmatprep.subr.bf16.mxu0 %v422_v13  ;;  %445 = vmatprep.subr.bf16.mxu1 %v422_v13 }
  0x11   :  { %425 = vmatpush3.bf16.msra.mxu0 %v422_v13  ;;  %453 = vmatpush3.bf16.msra.mxu1 %v422_v13 }
  0x12   :  { %427 = vmatprep.subr.bf16.mxu0 %v426_v16  ;;  %446 = vmatprep.subr.bf16.mxu1 %v426_v16 }
  0x15   :  { %429 = vmatpush3.bf16.msra.mxu0 %v426_v16  ;;  %454 = vmatpush3.bf16.msra.mxu1 %v426_v16 }
  0x16   :  { %431 = vmatprep.subr.bf16.mxu0 %v430_v19  ;;  %447 = vmatprep.subr.bf16.mxu1 %v430_v19 }
  0x19   :  { %433 = vmatpush3.bf16.msra.mxu0 %v430_v19  ;;  %455 = vmatpush3.bf16.msra.mxu1 %v430_v19 }
  0x1a   :  { %435 = vmatprep.subr.bf16.mxu0 %v434_v22  ;;  %448 = vmatprep.subr.bf16.mxu1 %v434_v22 }
  0x1d   :  { %437 = vmatpush3.bf16.msra.mxu0 %v434_v22  ;;  %456 = vmatpush3.bf16.msra.mxu1 %v434_v22 }
  0x1e   :  { %439 = vmatprep.subr.bf16.mxu0 %v438_v25  ;;  %449 = vmatprep.subr.bf16.mxu1 %v438_v25 }
  0x21   :  { %441 = vmatpush3.bf16.msra.mxu0 %v438_v25  ;;  %457 = vmatpush3.bf16.msra.mxu1 %v438_v25 }
  0x24   :  { %387 = vmatmul.mubr.f32.vlgmr.msra.gmra.mrb[0].mxu0 %v51_v26  ;;  %399 = vmatmul.mubr.f32.vlgmr.msra.gmra.mrb[0].mxu1 %v59_v27 }
  0x25   :  { %389 = vmatprep.mubr.f32.mxu0 %v52_v28  ;;  %401 = vmatprep.mubr.f32.mxu1 %v60_v29 }
  0x28   :  { %390 = vmatmul.mubr.f32.gmra.mrb[2].mxu0 %v53_v30  ;;  %402 = vmatmul.mubr.f32.gmra.mrb[2].mxu1 %v61_v31 }
  0x29   :  { %392 = vmatprep.mubr.f32.mxu0 %v54_v32  ;;  %404 = vmatprep.mubr.f32.mxu1 %v62_v33 }
  0x2c   :  { %393 = vmatmul.mubr.f32.gmra.mrb[4].mxu0 %v55_v34  ;;  %405 = vmatmul.mubr.f32.gmra.mrb[4].mxu1 %v63_v35 }
  0x2d   :  { %395 = vmatprep.mubr.f32.mxu0 %v56_v36  ;;  %407 = vmatprep.mubr.f32.mxu1 %v64_v37 }
  0x30   :  { %396 = vmatmul.mubr.f32.gmra.mrb[6].mxu0 %v57_v38  ;;  %408 = vmatmul.mubr.f32.gmra.mrb[6].mxu1 %v65_v39 }
  0xf7   :  { %v388_v41 = vpop.f32.mrb[0].mxu0  ;;  %v400_v42 = vpop.f32.mrb[0].mxu1 }
  0xf8   :  { %v286_v43 = vadd.f32 %v388_v41, %v321_v40  ;;  %v294_v44 = vadd.f32 %v400_v42, %v321_v40  ;;  %v148_v45 = vpop.f32.mrb[1].mxu0  ;;  %v188_v46 = vpop.f32.mrb[1].mxu1 }
  0xf9   :  { %v285_v47 = vadd.f32 %v321_v40, %v148_v45  ;;  %v293_v48 = vadd.f32 %v321_v40, %v188_v46 }
  0xfa   :  { %302 = vst [vmem:[%s628_s3 + $0x8] sm:$0xff] %v286_v43  ;;  %310 = vst [vmem:[%s628_s3 + $0x48] sm:$0xff] %v294_v44 }
  0xfb   :  { %301 = vst [vmem:[%s628_s3] sm:$0xff] %v285_v47  ;;  %309 = vst [vmem:[%s628_s3 + $0x40] sm:$0xff] %v293_v48  ;;  %v391_v49 = vpop.f32.mrb[2].mxu0  ;;  %v403_v50 = vpop.f32.mrb[2].mxu1 }
  0xfc   :  { %v288_v51 = vadd.f32 %v391_v49, %v321_v40  ;;  %v296_v52 = vadd.f32 %v403_v50, %v321_v40  ;;  %v158_v53 = vpop.f32.mrb[3].mxu0  ;;  %v198_v54 = vpop.f32.mrb[3].mxu1 }
  0xfd   :  { %v287_v55 = vadd.f32 %v321_v40, %v158_v53  ;;  %v295_v56 = vadd.f32 %v321_v40, %v198_v54 }
  0xfe   :  { %304 = vst [vmem:[%s628_s3 + $0x18] sm:$0xff] %v288_v51  ;;  %312 = vst [vmem:[%s628_s3 + $0x58] sm:$0xff] %v296_v52 }
  0xff   :  { %303 = vst [vmem:[%s628_s3 + $0x10] sm:$0xff] %v287_v55  ;;  %311 = vst [vmem:[%s628_s3 + $0x50] sm:$0xff] %v295_v56  ;;  %v394_v57 = vpop.f32.mrb[4].mxu0  ;;  %v406_v58 = vpop.f32.mrb[4].mxu1 }
 0x100   :  { %v290_v59 = vadd.f32 %v394_v57, %v321_v40  ;;  %v298_v60 = vadd.f32 %v406_v58, %v321_v40  ;;  %v168_v61 = vpop.f32.mrb[5].mxu0  ;;  %v208_v62 = vpop.f32.mrb[5].mxu1 }
 0x101   :  { %v289_v63 = vadd.f32 %v321_v40, %v168_v61  ;;  %v297_v0 = vadd.f32 %v321_v40, %v208_v62 }
 0x102   :  { %306 = vst [vmem:[%s628_s3 + $0x28] sm:$0xff] %v290_v59  ;;  %314 = vst [vmem:[%s628_s3 + $0x68] sm:$0xff] %v298_v60 }
 0x103   :  { %305 = vst [vmem:[%s628_s3 + $0x20] sm:$0xff] %v289_v63  ;;  %313 = vst [vmem:[%s628_s3 + $0x60] sm:$0xff] %v297_v0  ;;  %v397_v1 = vpop.f32.mrb[6].mxu0  ;;  %v409_v2 = vpop.f32.mrb[6].mxu1 }
 0x104   :  { %v292_v3 = vadd.f32 %v397_v1, %v321_v40  ;;  %v300_v4 = vadd.f32 %v409_v2, %v321_v40  ;;  %v178_v5 = vpop.f32.mrb[7].mxu0  ;;  %v218_v6 = vpop.f32.mrb[7].mxu1 }
 0x105   :  { %v291_v7 = vadd.f32 %v321_v40, %v178_v5  ;;  %v299_v8 = vadd.f32 %v321_v40, %v218_v6 }
 0x106   :  { %308 = vst [vmem:[%s628_s3 + $0x38] sm:$0xff] %v292_v3  ;;  %316 = vst [vmem:[%s628_s3 + $0x78] sm:$0xff] %v300_v4 }
 0x107   :  { %307 = vst [vmem:[%s628_s3 + $0x30] sm:$0xff] %v291_v7  ;;  %315 = vst [vmem:[%s628_s3 + $0x70] sm:$0xff] %v299_v8 }

</bundles_post_ra>
